<compile_context>
chip_gen: v7x
topology: tpu7x:2x2x1
jax: 0.10.0
libtpu: 0.0.40
codegen_flags: <defaults>
</compile_context>

<pallas_src>
import functools

import jax
import jax.numpy as jnp
from jax.experimental import pallas as pl
from jax.experimental.pallas import tpu as pltpu


def _label_smoothing_kernel(x_ref, t_ref, out_ref, *,
                            eps, confidence, n_valid_rows, block_rows):
    """One grid step: (block_rows, C) logits tile -> one partial loss sum.

    row_loss = -sum_c true_dist[c] * logprob[c]
             = lse - sum_c w[c] * shifted[c]
    with w[c] = confidence at the target class and eps = smoothing/(C-1)
    elsewhere, shifted = x - rowmax(x), lse = log(sum_c exp(shifted)).  The
    lse coefficient sum_c w[c] = confidence + eps*(C-1) == 1 exactly, so a
    single weighted lane reduction replaces the separate target-gather and
    full-row log-prob reductions (and no full true_dist is materialized).
    """
    i = pl.program_id(0)

    x = x_ref[...]                                          # (tb, C) native dtype
    tb, C = x.shape

    # Row max in the native dtype (exact); fuse the f32 upcast into the sub,
    # so no standalone f32 copy of the tile is kept live.
    m = jnp.max(x, axis=-1, keepdims=True)                  # (tb, 1)
    shifted = x.astype(jnp.float32) - m.astype(jnp.float32)  # (tb, C) f32

    # log-sum-exp along the class (lane) axis.
    lse = jnp.log(jnp.sum(jnp.exp(shifted), axis=-1, keepdims=True))  # (tb, 1)

    # Single weighted lane reduce (== the scatter_ of true_dist).
    col = jax.lax.broadcasted_iota(jnp.int32, (tb, C), 1)
    tgt = t_ref[...]                                        # (tb, 1) int32
    w = jnp.where(col == tgt, jnp.float32(confidence), jnp.float32(eps))
    weighted = jnp.sum(w * shifted, axis=-1, keepdims=True)  # (tb, 1)

    row_loss = lse - weighted                               # (tb, 1)

    # Mask the tail rows of the (unpadded) partial last block with `where`:
    # data there is undefined (possibly Inf/NaN), so 0/1-multiply is unsafe.
    row_idx = i * block_rows + jax.lax.broadcasted_iota(jnp.int32, (tb, 1), 0)
    row_loss = jnp.where(row_idx < n_valid_rows, row_loss, jnp.float32(0.0))

    out_ref[0, 0] = jnp.sum(row_loss)


def _sublane_granule(dtype):
    # Sub-32-bit dtypes pack 2x/4x rows per sublane group: 8 f32 / 16 bf16 / 32 i8.
    return max(8, 32 // jnp.dtype(dtype).itemsize)


def _vmem_capacity_bytes():
    try:
        cap = getattr(pltpu.get_tpu_info(), "vmem_capacity_bytes", None)
        if cap:
            return int(cap)
    except Exception:
        pass
    return 64 * 1024 * 1024        # conservative fallback: v7x per-TC VMEM


def label_smoothing_loss(x, target, *, smoothing=0.1, block_rows=None):
    """JAX wrapper. x: (B, C) float/bf16 logits, target: (B,) int labels in [0, C)."""
    B, C = x.shape
    assert C >= 2, "label smoothing needs >= 2 classes (eps = smoothing/(C-1))"
    confidence = 1.0 - smoothing
    eps = smoothing / (C - 1)
    itemsize = jnp.dtype(x.dtype).itemsize
    granule = _sublane_granule(x.dtype)

    # ~3/4 of physical VMEM: ~48 MiB on v7x (64 MiB), ~96 MiB on v5e/v6e (128 MiB).
    vmem_limit_bytes = (_vmem_capacity_bytes() * 3) // 4

    if block_rows is None:
        # VMEM per row: double-buffered x tile + ~5 live f32 (rows, C) temps in
        # the body (shifted, exp, iota, weights, product) + target column.
        per_row_bytes = C * (2 * itemsize + 5 * 4) + 2 * 4
        budget = int(vmem_limit_bytes * 0.8)                 # headroom for misc
        rows = max(granule, budget // per_row_bytes)
        rows = min(rows, pl.cdiv(B, granule) * granule)      # don't exceed batch
        block_rows = max(granule, (rows // granule) * granule)
    else:
        assert block_rows % granule == 0, (
            f"block_rows must be a multiple of {granule} for dtype {x.dtype}")

    n_tiles = pl.cdiv(B, block_rows)

    # No jnp.pad copy of x (saves a full HBM read+write when B % block_rows != 0):
    # the partial last block is masked inside the kernel instead.
    t2 = target.reshape(B, 1).astype(jnp.int32)

    kernel = functools.partial(
        _label_smoothing_kernel,
        eps=float(eps),
        confidence=float(confidence),
        n_valid_rows=B,
        block_rows=block_rows,
    )

    cost = pl.CostEstimate(
        flops=int(5 * B * C),
        transcendentals=int(B * C + B),
        bytes_accessed=int(B * C * itemsize + B * 4 + n_tiles * 4),
    )

    partial_sums = pl.pallas_call(
        kernel,
        out_shape=jax.ShapeDtypeStruct((n_tiles, 1), jnp.float32),
        grid_spec=pltpu.PrefetchScalarGridSpec(
            num_scalar_prefetch=0,
            grid=(n_tiles,),
            in_specs=[
                pl.BlockSpec((block_rows, C), lambda i: (i, 0)),
                pl.BlockSpec((block_rows, 1), lambda i: (i, 0)),
            ],
            out_specs=pl.BlockSpec((1, 1), lambda i: (i, 0),
                                   memory_space=pltpu.SMEM),
        ),
        compiler_params=pltpu.CompilerParams(
            dimension_semantics=("parallel",),     # independent tiles -> megacore
            vmem_limit_bytes=int(vmem_limit_bytes),
        ),
        cost_estimate=cost,
    )(x, t2)

    return jnp.sum(partial_sums) / jnp.float32(B)


def _reference(x, target, smoothing=0.1):
    """Pure-JAX reference mirroring the PyTorch forward."""
    B, C = x.shape
    confidence = 1.0 - smoothing
    logprobs = jax.nn.log_softmax(x.astype(jnp.float32), axis=-1)
    true_dist = jnp.full((B, C), smoothing / (C - 1), dtype=jnp.float32)
    true_dist = true_dist.at[jnp.arange(B), target].set(confidence)
    return jnp.mean(jnp.sum(-true_dist * logprobs, axis=-1))


if __name__ == "__main__":
    key = jax.random.PRNGKey(0)
    kx1, kt1, kx2, kt2 = jax.random.split(key, 4)
    smoothing = 0.1

    # Case 1: bf16 logits, auto tile sizing (single tile covers the batch).
    B1, C1 = 16, 128
    x1 = jax.random.normal(kx1, (B1, C1), dtype=jnp.float32).astype(jnp.bfloat16)
    t1 = jax.random.randint(kt1, (B1,), 0, C1, dtype=jnp.int32)
    loss1 = jax.block_until_ready(label_smoothing_loss(x1, t1, smoothing=smoothing))
    ref1 = _reference(x1, t1, smoothing=smoothing)
    assert jnp.allclose(loss1, ref1, atol=1e-4, rtol=1e-4), (loss1, ref1)

    # Case 2: f32 logits, B not divisible by the tile -> unpadded partial last
    # block + in-kernel where-mask, multi-step parallel grid.
    B2, C2 = 20, 128
    x2 = jax.random.normal(kx2, (B2, C2), dtype=jnp.float32)
    t2 = jax.random.randint(kt2, (B2,), 0, C2, dtype=jnp.int32)
    loss2 = jax.block_until_ready(
        label_smoothing_loss(x2, t2, smoothing=smoothing, block_rows=8))
    ref2 = _reference(x2, t2, smoothing=smoothing)
    assert jnp.allclose(loss2, ref2, atol=1e-5, rtol=1e-5), (loss2, ref2)

    # Case 3: auto tile sizing with non-divisible B (masked tail in auto path).
    loss3 = jax.block_until_ready(label_smoothing_loss(x2, t2, smoothing=smoothing))
    assert jnp.allclose(loss3, ref2, atol=1e-5, rtol=1e-5), (loss3, ref2)

    print("KERNEL_OK")
</pallas_src>

<mosaic_0001>
module attributes {stable_mosaic.version = 11 : i64} {
  func.func @_label_smoothing_kernel(%arg0: i32, %arg1: memref<16x128xbf16, #tpu.memory_space<vmem>>, %arg2: memref<16x1xi32, #tpu.memory_space<vmem>>, %arg3: memref<1x1xf32, #tpu.memory_space<smem>>) attributes {dimension_semantics = [#tpu.dimension_semantics<parallel>], iteration_bounds = array<i64: 1>, scalar_prefetch = 0 : i64, scratch_operands = 0 : i64, tpu.core_type = #tpu.core_type<tc>, window_params = [{transform_indices = @transform_0, window_bounds = array<i64: 16, 128>}, {transform_indices = @transform_1, window_bounds = array<i64: 16, 1>}, {transform_indices = @transform_2, window_bounds = array<i64: 1, 1>}]} {
    %c0 = arith.constant 0 : index
    %c0_0 = arith.constant 0 : index
    %0 = vector.load %arg1[%c0, %c0_0] : memref<16x128xbf16, #tpu.memory_space<vmem>>, vector<16x128xbf16>
    %cst = arith.constant dense<0xFF80> : vector<16xbf16>
    %1 = vector.multi_reduction <maximumf>, %0, %cst [1] : vector<16x128xbf16> to vector<16xbf16>
    %2 = vector.shape_cast %1 : vector<16xbf16> to vector<16x1xbf16>
    %3 = arith.extf %0 : vector<16x128xbf16> to vector<16x128xf32>
    %4 = arith.extf %2 : vector<16x1xbf16> to vector<16x1xf32>
    %5 = vector.broadcast %4 : vector<16x1xf32> to vector<16x128xf32>
    %6 = arith.subf %3, %5 : vector<16x128xf32>
    %7 = math.exp %6 : vector<16x128xf32>
    %cst_1 = arith.constant dense<0.000000e+00> : vector<16xf32>
    %8 = vector.multi_reduction <add>, %7, %cst_1 [1] : vector<16x128xf32> to vector<16xf32>
    %9 = vector.shape_cast %8 : vector<16xf32> to vector<16x1xf32>
    %10 = math.log %9 : vector<16x1xf32>
    %11 = tpu.iota {dimensions = array<i32: 1>} : vector<16x128xi32>
    %c0_2 = arith.constant 0 : index
    %c0_3 = arith.constant 0 : index
    %12 = vector.load %arg2[%c0_2, %c0_3] : memref<16x1xi32, #tpu.memory_space<vmem>>, vector<16x1xi32>
    %13 = vector.broadcast %12 : vector<16x1xi32> to vector<16x128xi32>
    %14 = arith.cmpi eq, %11, %13 : vector<16x128xi32>
    %cst_4 = arith.constant 0.899999976 : f32
    %cst_5 = arith.constant 7.87401571E-4 : f32
    %15 = vector.broadcast %cst_4 : f32 to vector<16x128xf32>
    %16 = vector.broadcast %cst_5 : f32 to vector<16x128xf32>
    %17 = arith.select %14, %15, %16 : vector<16x128xi1>, vector<16x128xf32>
    %18 = arith.mulf %17, %6 : vector<16x128xf32>
    %cst_6 = arith.constant dense<0.000000e+00> : vector<16xf32>
    %19 = vector.multi_reduction <add>, %18, %cst_6 [1] : vector<16x128xf32> to vector<16xf32>
    %20 = vector.shape_cast %19 : vector<16xf32> to vector<16x1xf32>
    %21 = arith.subf %10, %20 : vector<16x1xf32>
    %c16_i32 = arith.constant 16 : i32
    %22 = arith.muli %arg0, %c16_i32 : i32
    %23 = tpu.iota {dimensions = array<i32: 0>} : vector<16x1xi32>
    %24 = vector.broadcast %22 : i32 to vector<16x1xi32>
    %25 = arith.addi %24, %23 : vector<16x1xi32>
    %c16_i32_7 = arith.constant 16 : i32
    %26 = vector.broadcast %c16_i32_7 : i32 to vector<16x1xi32>
    %27 = arith.cmpi slt, %25, %26 : vector<16x1xi32>
    %cst_8 = arith.constant 0.000000e+00 : f32
    %28 = vector.broadcast %cst_8 : f32 to vector<16x1xf32>
    %29 = arith.select %27, %21, %28 : vector<16x1xi1>, vector<16x1xf32>
    %30 = vector.shape_cast %29 : vector<16x1xf32> to vector<1x16x1xf32>
    %cst_9 = arith.constant dense<0.000000e+00> : vector<1xf32>
    %31 = vector.multi_reduction <add>, %30, %cst_9 [1, 2] : vector<1x16x1xf32> to vector<1xf32>
    %32 = vector.shape_cast %31 : vector<1xf32> to vector<1x1x1xf32>
    %33 = vector.extract %32[0, 0, 0] : f32 from vector<1x1x1xf32>
    %c0_10 = arith.constant 0 : index
    %c0_11 = arith.constant 0 : index
    %34 = memref.load %arg3[%c0_10, %c0_11] : memref<1x1xf32, #tpu.memory_space<smem>>
    memref.store %33, %arg3[%c0_10, %c0_11] : memref<1x1xf32, #tpu.memory_space<smem>>
    return
  }
  func.func @transform_0(%arg0: i32) -> (i32, i32) {
    %c0_i32 = arith.constant 0 : i32
    %c0_i32_0 = arith.constant 0 : i32
    return %arg0, %c0_i32 : i32, i32
  }
  func.func @transform_1(%arg0: i32) -> (i32, i32) {
    %c0_i32 = arith.constant 0 : i32
    %c0_i32_0 = arith.constant 0 : i32
    return %arg0, %c0_i32 : i32, i32
  }
  func.func @transform_2(%arg0: i32) -> (i32, i32) {
    %c0_i32 = arith.constant 0 : i32
    %c0_i32_0 = arith.constant 0 : i32
    return %arg0, %c0_i32 : i32, i32
  }
}

</mosaic_0001>

<bundles_post_ra>
// kernel: tpu_custom_call.1
= control target key start
LH: loop header
LB: loop body
LE: loop exit
PB: predicated region body
PF: predicated region fallthrough
CT: control target
= control target key end

     0   :  { %v131_v2 = vmov 0   ;;  %s170_s0 = inlined_call_operand.vmem [shape: bf16[16,128], index: 0, kind: input, shape index: {}]   ;;  %s171_s1 = inlined_call_operand.vmem [shape: s32[16,1], index: 1, kind: input, shape index: {}]   ;;  %s172_s2 = inlined_call_operand.hbm [shape: f32[1,1], index: 2, kind: output, shape index: {}]  }
   0x1   :  { %v12_v0 = vld [vmem:[%s170_s0] sm:$0xff]   ;;  %v43_v1 = vld [vmem:[%s171_s1 + $0x8] sm:$0xff]  ;;  %108 = vset.pattern.permute.xlu1 %v131_v2  ;;  %107 = vset.pattern.permute.xlu0 %v131_v2 }
   0x2   :  { %7 = vsyncpa [#allocation3], 0  ;;  %48 = vperm.xlu1 %108, %v43_v1   ;;  %20 = vmax.xlane.bf16.xlu0 %v12_v0  ;;  %v42_v3 = vld [vmem:[%s171_s1] sm:$0xff]  ;;  %v22_v4 = vunpack.c.l.bf16 %v12_v0  ;;  %v23_v5 = vunpack.c.h.bf16 %v12_v0  ;;  %v40_v13 = vlaneseq  ;;  %v132_v19 = vmov 0.0007874016   ;;  %s119_s16 = scalar_lea.hbm %s172_s2, 16 }
   0x3   :  { %vm73_vm2 = vcmask 7168   ;;  %p120_p0 = scmp.ne.s32.totalorder %s172_s2, %s119_s16  ;;  %p123_p1 = scmp.lt.u32.totalorder %s119_s16, %s172_s2 }
   0x4   :  { %v41_v15 = vand.u32 127, %v40_v13 }
   0x5   :  { %p125_p2 = pnand %p123_p1, %p120_p0 }
  0x1c   :  { %45 = vperm.xlu0 %107, %v42_v3  }
  0x81   :  { %v49_v17 = vpop.permute.xlu1 %48 }
  0x82   :  { %vm51_vm1 = vcmp.eq.s32.totalorder %v41_v15, %v49_v17 }
  0x83   :  { %v53_v22 = vsel %vm51_vm1, 0.9, %v132_v19 }
  0x93   :  { %v21_v6 = vpop.xlane.xlu0 %20 }
  0x94   :  { %v24_v7 = vunpack.c.l.bf16 %v21_v6  ;;  %v25_v8 = vunpack.c.h.bf16 %v21_v6 }
  0x96   :  { %v26_v9 = vsub.f32 %v22_v4, %v24_v7  ;;  %v27_v10 = vsub.f32 %v23_v5, %v25_v8 }
  0x98   :  { %v28_v11 = vmul.f32 1.442695, %v26_v9  ;;  %v30_v12 = vmul.f32 1.442695, %v27_v10  ;;  %v55_v23 = vmul.f32 %v53_v22, %v27_v10 }
  0x9a   :  { %111 = vpow2.f32 %v28_v11 }
  0x9b   :  { %113 = vpow2.f32 %v30_v12  ;;  %v46_v14 = vpop.permute.xlu0 %45 }
  0x9c   :  { %vm50_vm0 = vcmp.eq.s32.totalorder %v41_v15, %v46_v14 }
  0x9d   :  { %v52_v20 = vsel %vm50_vm0, 0.9, %v132_v19 }
  0x9e   :  { %v54_v21 = vmul.f32 %v52_v20, %v26_v9 }
  0xa4   :  { %v112_v16 = vpop.eup %111 }
  0xa5   :  { %32 = vadd.xlane.f32.xlu1 %v112_v16  ;;  %v114_v18 = vpop.eup %113 }
  0xa9   :  { %34 = vadd.xlane.f32.xlu1 %v114_v18 }
  0xad   :  { %56 = vadd.xlane.f32.xlu1 %v54_v21 }
  0xb1   :  { %58 = vadd.xlane.f32.xlu1 %v55_v23 }
 0x132   :  { %v33_v24 = vpop.xlane.xlu1 %32 }
 0x133   :  { %115 = vlog2.f32 %v33_v24 }
 0x136   :  { %v35_v25 = vpop.xlane.xlu1 %34 }
 0x137   :  { %117 = vlog2.f32 %v35_v25 }
 0x13a   :  { %v57_v27 = vpop.xlane.xlu1 %56 }
 0x13d   :  { %v116_v26 = vpop.eup %115 }
 0x13e   :  { %v37_v28 = vmul.f32 0.6931472, %v116_v26  ;;  %v59_v32 = vpop.xlane.xlu1 %58 }
 0x140   :  { %v60_v30 = vsub.f32 %v37_v28, %v57_v27 }
 0x141   :  { %v118_v29 = vpop.eup %117 }
 0x142   :  { %v39_v31 = vmul.f32 0.6931472, %v118_v29  ;;  %v74_v34 = vsel %vm73_vm2, %v60_v30, 0.0 }
 0x144   :  { %v61_v33 = vsub.f32 %v39_v31, %v59_v32 }
 0x146   :  { %v75_v35 = vsel %vm73_vm2, %v61_v33, 0.0 }
 0x147   :  { %v76_v36 = vadd.f32 %v75_v35, %v74_v34 }
 0x149   :  { %77 = vadd.xlane.f32.xlu1 %v76_v36 }
 0x1d6   :  { %v78_v37 = vpop.xlane.xlu1 %77 }
 0x1d7   :  { %v79_v38 = vrot.slane %v78_v37, 4 }
 0x1d9   :  { %v80_v39 = vadd.f32 %v79_v38, %v78_v37 }
 0x1db   :  { %v81_v40 = vrot.slane %v80_v39, 2 }
 0x1dd   :  { %v82_v41 = vadd.f32 %v81_v40, %v80_v39 }
 0x1df   :  { %v83_v42 = vrot.slane %v82_v41, 1 }
 0x1e1   :  { %v84_v43 = vadd.f32 %v83_v42, %v82_v41 }
 0x1e3   :  { %102 = vpush %v84_v43 }
 0x214   :  { %s103_s0 = spop %102 }
 0x215   :  { %87 = sst [smem:[#allocation2]] %s103_s0 }
 0x216   :  { %128 = shalt.err (!%p125_p2)
}
 0x217   :  { %s133_s21 = smov [#allocation2]  }
 0x218   :  { %95 = dma.smem_to_hbm %s133_s21, 16, %s172_s2, [#allocation3]  }
 0x219   :  { %129 = dma.done.wait [#allocation3], 16  }
 0x21a   :  { %130 = vsyncadd [#allocation3], 4294967280 }
 0x21b   :  { %99 = sfence }
 0x21c   :  { %100 = vsyncpa [#allocation3], 1 }

</bundles_post_ra>
